<compile_context>
chip_gen: v7x
topology: tpu7x:2x2x1
jax: 0.10.0
libtpu: 0.0.40
codegen_flags: <defaults>
</compile_context>

<pallas_src>
import functools

import jax
import jax.numpy as jnp
from jax import lax
from jax.experimental import pallas as pl
from jax.experimental.pallas import tpu as pltpu


def _conv_cos_kernel(x_ref, w_ref, b_ref, o_ref, *, offsets):
    """Single grid step covering the whole batch.

    x_ref: (B, C, Lin)   flattened padded images (+ whole-row zero tail), staging dtype
    w_ref: (O, K)        K = kh*kw*C, row-block index i*kw+j, channel-minor, staging dtype
    b_ref: (O, 1)        f32 bias column
    o_ref: (B, O, L)     lane-dense (L % 128 == 0) dense stride-1 conv output, then cos
    """
    L = o_ref.shape[-1]
    w = w_ref[...]                      # resident weights, reused for every image
    bias = b_ref[...]
    for b in range(o_ref.shape[0]):     # B is static & tiny -> fully unrolled
        xb = x_ref[b]                   # one load of the whole (C, Lin) slab
        # Fused im2col: each shifted window is a *static* lane slice of the loaded slab,
        # staged once into a single (K, L) operand (shift/alignment work paid once per
        # image, not once per dot operand).
        xs = jnp.concatenate([xb[:, off:off + L] for off in offsets], axis=0)
        # One K = kh*kw*C MXU dot per image, f32 accumulation.
        acc = jnp.dot(w, xs, preferred_element_type=jnp.float32)       # (O, L) f32
        o_ref[b] = jnp.cos(acc + bias).astype(o_ref.dtype)


def _round_up(a, m):
    return (a + m - 1) // m * m


@functools.partial(jax.jit, static_argnames=("stride", "padding", "staging_dtype"))
def random_cos_forward(x, weight, bias, *, stride=1, padding=0,
                       staging_dtype=jnp.float32):
    """Equivalent of torch.cos(F.conv2d(x, weight, bias, stride, padding)).

    x:      (B, C, H, W)   float32, NCHW
    weight: (O, C, kh, kw) float32
    bias:   (O,)           float32
    staging_dtype: dtype for the HBM->VMEM leg of x / weight.  Use jnp.bfloat16 on v6e /
        v7x (and optionally v5e) to halve input DMA bytes; accumulation, bias and the
        output stay float32 either way.
    returns (B, O, Ho, Wo) float32, NCHW
    """
    B, C, H, W = x.shape
    O, Cw, kh, kw = weight.shape
    assert C == Cw, "channel mismatch"

    Hp, Wp = H + 2 * padding, W + 2 * padding
    Ho = (Hp - kh) // stride + 1
    Wo = (Wp - kw) // stride + 1

    LANE = 128
    Lout = Hp * Wp                       # dense stride-1 output positions per image
    Lout_pad = _round_up(Lout, LANE)     # lane-aligned output width (unmasked vst)
    halo = (kh - 1) * Wp + (kw - 1)      # largest shift added to an output position

    # SINGLE jnp.pad over x: conv spatial padding + enough extra zero bottom rows that
    # every static slice [off, off + Lout_pad) stays inside the flattened slab.  The
    # reshape below is a free contiguous collapse; the staging-dtype cast fuses into this
    # same pad pass, so x is touched exactly once in HBM before the kernel.
    extra_rows = -(-(Lout_pad + halo - Lout) // Wp)          # ceil, always >= 1
    Lin = Lout + extra_rows * Wp
    x_pad = jnp.pad(x, ((0, 0), (0, 0),
                        (padding, padding + extra_rows),
                        (padding, padding)))
    x_flat = x_pad.reshape(B, C, Lin).astype(staging_dtype)

    # w_flat[o, (i*kw + j)*C + c] == weight[o, c, i, j]  — matches the im2col row order.
    K = kh * kw * C
    w_flat = weight.transpose(0, 2, 3, 1).reshape(O, K).astype(staging_dtype)
    b_col = bias.reshape(O, 1).astype(jnp.float32)
    offsets = tuple(i * Wp + j for i in range(kh) for j in range(kw))

    out_flat = pl.pallas_call(
        functools.partial(_conv_cos_kernel, offsets=offsets),
        out_shape=jax.ShapeDtypeStruct((B, O, Lout_pad), jnp.float32),
        grid=(1,),                       # single step: whole batch as one lane-dense block
        in_specs=[
            pl.BlockSpec((B, C, Lin), lambda i: (0, 0, 0)),   # all images, one DMA
            pl.BlockSpec((O, K), lambda i: (0, 0)),           # weights (resident)
            pl.BlockSpec((O, 1), lambda i: (0, 0)),           # bias (resident)
        ],
        out_specs=pl.BlockSpec((B, O, Lout_pad), lambda i: (0, 0, 0)),
        compiler_params=pltpu.CompilerParams(
            dimension_semantics=("arbitrary",)),
    )(x_flat, w_flat, b_col)

    # (B, O, Lout_pad) -> (B, O, Hp, Wp) is a cheap slice + free reshape of the small
    # output; then take the valid / strided window.  Output is NCHW directly — no
    # post-kernel transpose.  (For stride > 1 the kernel computes the dense stride-1 map
    # and subsamples here; exact for the module's default stride=1.)
    out = out_flat[:, :, :Lout].reshape(B, O, Hp, Wp)
    out = out[:, :, : (Ho - 1) * stride + 1 : stride,
                    : (Wo - 1) * stride + 1 : stride]
    return out


def _reference(x, weight, bias, stride, padding):
    y = lax.conv_general_dilated(
        x, weight,
        window_strides=(stride, stride),
        padding=((padding, padding), (padding, padding)),
        dimension_numbers=("NCHW", "OIHW", "NCHW"),
    )
    return jnp.cos(y + bias.reshape(1, -1, 1, 1))


if __name__ == "__main__":
    key = jax.random.PRNGKey(0)
    k_x, k_w, k_b = jax.random.split(key, 3)

    # Module-equivalent toy sizes: RandomCos(4, 8, 3) applied to a (2, 4, 16, 16) input.
    B, C, H, W = 2, 4, 16, 16
    O, kh, kw = 8, 3, 3

    x = jax.random.normal(k_x, (B, C, H, W), dtype=jnp.float32)
    # Deterministic synthetic frozen parameters (the module registers random conv
    # weight/bias as buffers; any fixed values are faithful).
    fan_in = C * kh * kw
    bound = 1.0 / (fan_in ** 0.5)
    weight = jax.random.uniform(k_w, (O, C, kh, kw), jnp.float32, -bound, bound)
    bias = jax.random.uniform(k_b, (O,), jnp.float32, -bound, bound)

    # Exact-semantics (f32 staging) checks against the dense conv reference.
    for stride, padding in ((1, 0), (1, 1), (2, 0)):
        out = random_cos_forward(x, weight, bias, stride=stride, padding=padding,
                                 staging_dtype=jnp.float32)
        out = jax.block_until_ready(out)
        ref = _reference(x, weight, bias, stride, padding)
        assert out.shape == ref.shape, (out.shape, ref.shape)
        err = float(jnp.max(jnp.abs(out - ref)))
        assert jnp.allclose(out, ref, atol=1e-5, rtol=1e-5), (stride, padding, err)

    # bf16-staged variant (v6e/v7x input-DMA optimization): operands rounded to bf16 for
    # the HBM->VMEM leg only, accumulation/output stay f32 — compare to the f32 reference
    # with a bf16-level tolerance.
    out_bf16 = jax.block_until_ready(
        random_cos_forward(x, weight, bias, stride=1, padding=1,
                           staging_dtype=jnp.bfloat16))
    ref_11 = _reference(x, weight, bias, 1, 1)
    err_bf16 = float(jnp.max(jnp.abs(out_bf16 - ref_11)))
    assert jnp.allclose(out_bf16, ref_11, atol=8e-2, rtol=0.0), err_bf16

    print("KERNEL_OK")
</pallas_src>

<mosaic_0001>
module attributes {stable_mosaic.version = 11 : i64} {
  func.func @_conv_cos_kernel(%arg0: i32, %arg1: memref<2x4x304xf32, #tpu.memory_space<vmem>>, %arg2: memref<8x36xf32, #tpu.memory_space<vmem>>, %arg3: memref<8x1xf32, #tpu.memory_space<vmem>>, %arg4: memref<2x8x256xf32, #tpu.memory_space<vmem>>) attributes {dimension_semantics = [#tpu.dimension_semantics<arbitrary>], iteration_bounds = array<i64: 1>, scalar_prefetch = 0 : i64, scratch_operands = 0 : i64, tpu.core_type = #tpu.core_type<tc>, window_params = [{pipeline_mode = #tpu.pipeline_mode<synchronous>, transform_indices = @transform_0, window_bounds = array<i64: 2, 4, 304>}, {pipeline_mode = #tpu.pipeline_mode<synchronous>, transform_indices = @transform_1, window_bounds = array<i64: 8, 36>}, {pipeline_mode = #tpu.pipeline_mode<synchronous>, transform_indices = @transform_2, window_bounds = array<i64: 8, 1>}, {pipeline_mode = #tpu.pipeline_mode<synchronous>, transform_indices = @transform_3, window_bounds = array<i64: 2, 8, 256>}]} {
    %c0 = arith.constant 0 : index
    %c0_0 = arith.constant 0 : index
    %0 = vector.load %arg2[%c0, %c0_0] : memref<8x36xf32, #tpu.memory_space<vmem>>, vector<8x36xf32>
    %c0_1 = arith.constant 0 : index
    %c0_2 = arith.constant 0 : index
    %1 = vector.load %arg3[%c0_1, %c0_2] : memref<8x1xf32, #tpu.memory_space<vmem>>, vector<8x1xf32>
    %c0_3 = arith.constant 0 : index
    %c0_4 = arith.constant 0 : index
    %c0_5 = arith.constant 0 : index
    %2 = vector.load %arg1[%c0_3, %c0_4, %c0_5] : memref<2x4x304xf32, #tpu.memory_space<vmem>>, vector<1x4x304xf32>
    %3 = vector.shape_cast %2 : vector<1x4x304xf32> to vector<4x304xf32>
    %4 = vector.extract_strided_slice %3 {offsets = [0, 0], sizes = [4, 256], strides = [1, 1]} : vector<4x304xf32> to vector<4x256xf32>
    %5 = vector.extract_strided_slice %3 {offsets = [0, 1], sizes = [4, 256], strides = [1, 1]} : vector<4x304xf32> to vector<4x256xf32>
    %6 = vector.extract_strided_slice %3 {offsets = [0, 2], sizes = [4, 256], strides = [1, 1]} : vector<4x304xf32> to vector<4x256xf32>
    %7 = vector.extract_strided_slice %3 {offsets = [0, 16], sizes = [4, 256], strides = [1, 1]} : vector<4x304xf32> to vector<4x256xf32>
    %8 = vector.extract_strided_slice %3 {offsets = [0, 17], sizes = [4, 256], strides = [1, 1]} : vector<4x304xf32> to vector<4x256xf32>
    %9 = vector.extract_strided_slice %3 {offsets = [0, 18], sizes = [4, 256], strides = [1, 1]} : vector<4x304xf32> to vector<4x256xf32>
    %10 = vector.extract_strided_slice %3 {offsets = [0, 32], sizes = [4, 256], strides = [1, 1]} : vector<4x304xf32> to vector<4x256xf32>
    %11 = vector.extract_strided_slice %3 {offsets = [0, 33], sizes = [4, 256], strides = [1, 1]} : vector<4x304xf32> to vector<4x256xf32>
    %12 = vector.extract_strided_slice %3 {offsets = [0, 34], sizes = [4, 256], strides = [1, 1]} : vector<4x304xf32> to vector<4x256xf32>
    %13 = tpu.concatenate %4, %5, %6, %7, %8, %9, %10, %11, %12 in 0 : vector<4x256xf32>, vector<4x256xf32>, vector<4x256xf32>, vector<4x256xf32>, vector<4x256xf32>, vector<4x256xf32>, vector<4x256xf32>, vector<4x256xf32>, vector<4x256xf32> -> vector<36x256xf32>
    %cst = arith.constant dense<0.000000e+00> : vector<8x256xf32>
    %14 = tpu.matmul %0, %13, %cst {dimension_numbers = #tpu.dot_dimension_numbers<[1], [0], [0], [1], [0, 0, 1, 1], [], []>} : vector<8x36xf32>, vector<36x256xf32>, vector<8x256xf32> -> vector<8x256xf32>
    %15 = vector.broadcast %1 : vector<8x1xf32> to vector<8x256xf32>
    %16 = arith.addf %14, %15 : vector<8x256xf32>
    %17 = math.cos %16 : vector<8x256xf32>
    %c0_6 = arith.constant 0 : index
    %c0_7 = arith.constant 0 : index
    %c0_8 = arith.constant 0 : index
    %18 = vector.load %arg4[%c0_6, %c0_7, %c0_8] : memref<2x8x256xf32, #tpu.memory_space<vmem>>, vector<1x8x256xf32>
    %19 = vector.shape_cast %18 : vector<1x8x256xf32> to vector<8x256xf32>
    %20 = vector.shape_cast %17 : vector<8x256xf32> to vector<1x8x256xf32>
    tpu.vector_store %arg4[%c0_6, %c0_7, %c0_8], %20 {strides = array<i32>} : memref<2x8x256xf32, #tpu.memory_space<vmem>>, vector<1x8x256xf32>,
    %c1 = arith.constant 1 : index
    %c0_9 = arith.constant 0 : index
    %c0_10 = arith.constant 0 : index
    %21 = vector.load %arg1[%c1, %c0_9, %c0_10] : memref<2x4x304xf32, #tpu.memory_space<vmem>>, vector<1x4x304xf32>
    %22 = vector.shape_cast %21 : vector<1x4x304xf32> to vector<4x304xf32>
    %23 = vector.extract_strided_slice %22 {offsets = [0, 0], sizes = [4, 256], strides = [1, 1]} : vector<4x304xf32> to vector<4x256xf32>
    %24 = vector.extract_strided_slice %22 {offsets = [0, 1], sizes = [4, 256], strides = [1, 1]} : vector<4x304xf32> to vector<4x256xf32>
    %25 = vector.extract_strided_slice %22 {offsets = [0, 2], sizes = [4, 256], strides = [1, 1]} : vector<4x304xf32> to vector<4x256xf32>
    %26 = vector.extract_strided_slice %22 {offsets = [0, 16], sizes = [4, 256], strides = [1, 1]} : vector<4x304xf32> to vector<4x256xf32>
    %27 = vector.extract_strided_slice %22 {offsets = [0, 17], sizes = [4, 256], strides = [1, 1]} : vector<4x304xf32> to vector<4x256xf32>
    %28 = vector.extract_strided_slice %22 {offsets = [0, 18], sizes = [4, 256], strides = [1, 1]} : vector<4x304xf32> to vector<4x256xf32>
    %29 = vector.extract_strided_slice %22 {offsets = [0, 32], sizes = [4, 256], strides = [1, 1]} : vector<4x304xf32> to vector<4x256xf32>
    %30 = vector.extract_strided_slice %22 {offsets = [0, 33], sizes = [4, 256], strides = [1, 1]} : vector<4x304xf32> to vector<4x256xf32>
    %31 = vector.extract_strided_slice %22 {offsets = [0, 34], sizes = [4, 256], strides = [1, 1]} : vector<4x304xf32> to vector<4x256xf32>
    %32 = tpu.concatenate %23, %24, %25, %26, %27, %28, %29, %30, %31 in 0 : vector<4x256xf32>, vector<4x256xf32>, vector<4x256xf32>, vector<4x256xf32>, vector<4x256xf32>, vector<4x256xf32>, vector<4x256xf32>, vector<4x256xf32>, vector<4x256xf32> -> vector<36x256xf32>
    %cst_11 = arith.constant dense<0.000000e+00> : vector<8x256xf32>
    %33 = tpu.matmul %0, %32, %cst_11 {dimension_numbers = #tpu.dot_dimension_numbers<[1], [0], [0], [1], [0, 0, 1, 1], [], []>} : vector<8x36xf32>, vector<36x256xf32>, vector<8x256xf32> -> vector<8x256xf32>
    %34 = vector.broadcast %1 : vector<8x1xf32> to vector<8x256xf32>
    %35 = arith.addf %33, %34 : vector<8x256xf32>
    %36 = math.cos %35 : vector<8x256xf32>
    %c1_12 = arith.constant 1 : index
    %c0_13 = arith.constant 0 : index
    %c0_14 = arith.constant 0 : index
    %37 = vector.load %arg4[%c1_12, %c0_13, %c0_14] : memref<2x8x256xf32, #tpu.memory_space<vmem>>, vector<1x8x256xf32>
    %38 = vector.shape_cast %37 : vector<1x8x256xf32> to vector<8x256xf32>
    %39 = vector.shape_cast %36 : vector<8x256xf32> to vector<1x8x256xf32>
    tpu.vector_store %arg4[%c1_12, %c0_13, %c0_14], %39 {strides = array<i32>} : memref<2x8x256xf32, #tpu.memory_space<vmem>>, vector<1x8x256xf32>,
    return
  }
  func.func @transform_0(%arg0: i32) -> (i32, i32, i32) {
    %c0_i32 = arith.constant 0 : i32
    %c0_i32_0 = arith.constant 0 : i32
    %c0_i32_1 = arith.constant 0 : i32
    %c0_i32_2 = arith.constant 0 : i32
    return %c0_i32, %c0_i32_0, %c0_i32_1 : i32, i32, i32
  }
  func.func @transform_1(%arg0: i32) -> (i32, i32) {
    %c0_i32 = arith.constant 0 : i32
    %c0_i32_0 = arith.constant 0 : i32
    %c0_i32_1 = arith.constant 0 : i32
    return %c0_i32, %c0_i32_0 : i32, i32
  }
  func.func @transform_2(%arg0: i32) -> (i32, i32) {
    %c0_i32 = arith.constant 0 : i32
    %c0_i32_0 = arith.constant 0 : i32
    %c0_i32_1 = arith.constant 0 : i32
    return %c0_i32, %c0_i32_0 : i32, i32
  }
  func.func @transform_3(%arg0: i32) -> (i32, i32, i32) {
    %c0_i32 = arith.constant 0 : i32
    %c0_i32_0 = arith.constant 0 : i32
    %c0_i32_1 = arith.constant 0 : i32
    %c0_i32_2 = arith.constant 0 : i32
    return %c0_i32, %c0_i32_0, %c0_i32_1 : i32, i32, i32
  }
}

</mosaic_0001>

<bundles_post_ra>
// kernel: random_cos_forward.1
= control target key start
LH: loop header
LB: loop body
LE: loop exit
PB: predicated region body
PF: predicated region fallthrough
CT: control target
= control target key end

     0   :  { %s997_s20 = smov 112   ;;  %s998_s21 = smov 127   ;;  %v1004_v16 = vmov 0.0   ;;  %v1006_v17 = vmov 0   ;;  %vm30_vm0 = vcmask 1039360   ;;  %vm52_vm1 = vcmask 916480   ;;  %s1453_s0 = inlined_call_operand.vmem [shape: f32[2,4,304], index: 0, kind: input, shape index: {}]   ;;  %s1454_s2 = inlined_call_operand.vmem [shape: f32[8,1], index: 2, kind: input, shape index: {}]   ;;  %s1455_s1 = inlined_call_operand.vmem [shape: f32[8,36], index: 1, kind: input, shape index: {}]   ;;  %s1456_s3 = inlined_call_operand.vmem [shape: f32[2,8,256], index: 3, kind: output, shape index: {}]  }
   0x1   :  { %v1036_v0 = vld [vmem:[%s1453_s0] sm:$0xff]  ;;  %v17_v1 = vld [vmem:[%s1453_s0 + $0x8] sm:$0xf]  ;;  %v806_v3 = vld [vmem:[%s1453_s0 + $0x14] sm:$0xf]  ;;  %s1000_s22 = smov 111   ;;  %196 = vmatprep.mubr.f32.mxu0 %v1004_v16  ;;  %574 = vmatprep.mubr.f32.mxu1 %v1004_v16 }
   0x2   :  { %v23_v2 = vcombine.low %v17_v1, %v17_v1  ;;  %v1046_v4 = vcombine.high %v1036_v0, %v1036_v0  ;;  %v1051_v5 = vld [vmem:[%s1453_s0 + $0xc] sm:$0xff]  ;;  %v419_v6 = vcombine.low %v806_v3, %v806_v3  ;;  %v22_v11 = vcombine.low %v1036_v0, %v1036_v0  ;;  %s999_s0 = smov 126   ;;  %s1001_s23 = smov 96   ;;  %973 = vset.pattern.permute.xlu1 %v1006_v17  ;;  %v15_v18 = vld [vmem:[%s1454_s2] sm:$0xff] }
   0x3   :  { %v1058_v10 = vcombine.high %v1051_v5, %v1051_v5  ;;  %v418_v13 = vcombine.low %v1051_v5, %v1051_v5  ;;  %v903_v14 = vpack.i.bf16 %v1051_v5, %v1036_v0  ;;  %s1002_s24 = smov 110   ;;  %s1003_s25 = smov 95   ;;  %974 = vset.pattern.permute.xlu0 %v1006_v17  ;;  %vm41_vm2 = vcmask 1031168  }
   0x4   :  { %v878_v7 = vpack.i.bf16 %v23_v2, %v1036_v0  ;;  %v883_v8 = vpack.i.bf16 %v419_v6, %v1051_v5  ;;  %v873_v9 = vpack.i.bf16 %v17_v1, %v1046_v4  ;;  %s1005_s26 = smov 94   ;;  %vm110_vm3 = vcmask 1043456  }
   0x5   :  { %v888_v12 = vpack.i.bf16 %v806_v3, %v1058_v10  ;;  %v898_v15 = vpack.i.bf16 %v418_v13, %v22_v11  ;;  %vm85_vm4 = vcmask 785408   ;;  %vm63_vm5 = vcmask 908288  }
   0x6   :  { %879 = vrot.lane.b32.xlu1 %v878_v7, %s997_s20  ;;  %869 = vrot.lane.b32.xlu0 %v878_v7, %s998_s21  ;;  %vm74_vm6 = vcmask 900096   ;;  %vm96_vm7 = vcmask 777216   ;;  %vm107_vm8 = vcmask 769024   ;;  %vm124_vm9 = vcmask 293888  }
   0xa   :  { %884 = vrot.lane.b32.xlu1 %v883_v8, %s998_s21  ;;  %874 = vrot.lane.b32.xlu0 %v873_v9, %s999_s0 }
   0xe   :  { %894 = vrot.lane.b32.xlu1 %v883_v8, %s997_s20  ;;  %889 = vrot.lane.b32.xlu0 %v888_v12, %s999_s0 }
  0x12   :  { %904 = vrot.lane.b32.xlu1 %v903_v14, %s999_s0  ;;  %899 = vrot.lane.b32.xlu0 %v898_v15, %s998_s21 }
  0x16   :  { %914 = vrot.lane.b32.xlu1 %v873_v9, %s1000_s22  ;;  %909 = vrot.lane.b32.xlu0 %v898_v15, %s997_s20 }
  0x1a   :  { %924 = vrot.lane.b32.xlu1 %v873_v9, %s1001_s23  ;;  %919 = vrot.lane.b32.xlu0 %v878_v7, %s1002_s24 }
  0x1e   :  { %934 = vrot.lane.b32.xlu1 %v888_v12, %s1000_s22  ;;  %929 = vrot.lane.b32.xlu0 %v878_v7, %s1003_s25 }
  0x22   :  { %944 = vrot.lane.b32.xlu1 %v888_v12, %s1001_s23  ;;  %939 = vrot.lane.b32.xlu0 %v883_v8, %s1002_s24 }
  0x26   :  { %954 = vrot.lane.b32.xlu1 %v903_v14, %s1000_s22  ;;  %949 = vrot.lane.b32.xlu0 %v883_v8, %s1003_s25 }
  0x2a   :  { %964 = vrot.lane.b32.xlu1 %v903_v14, %s1001_s23  ;;  %959 = vrot.lane.b32.xlu0 %v898_v15, %s1002_s24 }
  0x2e   :  { %103 = vrot.lane.b32.xlu1 %v1046_v4, %s1005_s26  ;;  %969 = vrot.lane.b32.xlu0 %v898_v15, %s1003_s25 }
  0x32   :  { %492 = vrot.lane.b32.xlu1 %v1058_v10, %s1005_s26  ;;  %105 = vrot.lane.b32.xlu0 %v17_v1, %s1005_s26 }
  0x36   :  { %101 = vrot.lane.b32.xlu1 %v1036_v0, %s1005_s26  ;;  %494 = vrot.lane.b32.xlu0 %v806_v3, %s1005_s26 }
  0x3a   :  { %490 = vrot.lane.b32.xlu0 %v1051_v5, %s1005_s26  ;;  %121 = vperm.xlu1 %973, %v15_v18  }
  0x78   :  { %v880_v19 = vpop.permute.xlu1 %879  ;;  %v870_v20 = vpop.permute.xlu0 %869 }
  0x79   :  { %v882_v21 = vunpack.i.h.bf16 %v880_v19  ;;  %v881_v22 = vunpack.i.l.bf16 %v880_v19  ;;  %v872_v23 = vunpack.i.h.bf16 %v870_v20  ;;  %v871_v24 = vunpack.i.l.bf16 %v870_v20 }
  0x7b   :  { %v32_v27 = vsel %vm30_vm0, %v871_v24, %v872_v23  ;;  %v54_v28 = vsel %vm52_vm1, %v881_v22, %v882_v21 }
  0x7c   :  { %v885_v25 = vpop.permute.xlu1 %884  ;;  %v875_v26 = vpop.permute.xlu0 %874  ;;  %v112_v36 = vsel %vm110_vm3, %v1046_v4, %v32_v27 }
  0x7d   :  { %v887_v29 = vunpack.i.h.bf16 %v885_v25  ;;  %v886_v30 = vunpack.i.l.bf16 %v885_v25  ;;  %v877_v31 = vunpack.i.h.bf16 %v875_v26  ;;  %v876_v32 = vunpack.i.l.bf16 %v875_v26 }
  0x7f   :  { %v43_v33 = vsel %vm41_vm2, %v876_v32, %v877_v31  ;;  %v427_v38 = vsel %vm30_vm0, %v886_v30, %v887_v29 }
  0x80   :  { %v895_v34 = vpop.permute.xlu1 %894  ;;  %v890_v35 = vpop.permute.xlu0 %889  ;;  %v114_v37 = vsel %vm110_vm3, %v43_v33, %v54_v28  ;;  %v499_v46 = vsel %vm110_vm3, %v1058_v10, %v427_v38 }
  0x81   :  { %v897_v39 = vunpack.i.h.bf16 %v895_v34  ;;  %v896_v40 = vunpack.i.l.bf16 %v895_v34  ;;  %v892_v41 = vunpack.i.h.bf16 %v890_v35  ;;  %v891_v42 = vunpack.i.l.bf16 %v890_v35 }
  0x82   :  { %v820_v43 = vpack.c.bf16 %v114_v37, %v112_v36 }
  0x83   :  { %v437_v44 = vsel %vm41_vm2, %v891_v42, %v892_v41  ;;  %v447_v45 = vsel %vm52_vm1, %v896_v40, %v897_v39 }
  0x84   :  { %821 = vmatprep.subr.bf16.mxu0 %v820_v43  ;;  %v905_v47 = vpop.permute.xlu1 %904  ;;  %v900_v48 = vpop.permute.xlu0 %899  ;;  %v501_v49 = vsel %vm110_vm3, %v437_v44, %v447_v45 }
  0x85   :  { %v902_v50 = vunpack.i.h.bf16 %v900_v48  ;;  %v901_v51 = vunpack.i.l.bf16 %v900_v48  ;;  %v828_v52 = vpack.c.bf16 %v501_v49, %v499_v46  ;;  %v907_v53 = vunpack.i.h.bf16 %v905_v47 }
  0x86   :  { %v906_v54 = vunpack.i.l.bf16 %v905_v47 }
  0x87   :  { %829 = vmatprep.subr.bf16.mxu1 %v828_v52  ;;  %v31_v59 = vsel %vm30_vm0, %v901_v51, %v871_v24  ;;  %v426_v60 = vsel %vm30_vm0, %v902_v50, %v886_v30  ;;  %v436_v63 = vsel %vm41_vm2, %v907_v53, %v891_v42 }
  0x88   :  { %v1086_v55 = vpop.permute.xlu1 %914  ;;  %v910_v56 = vpop.permute.xlu0 %909  ;;  %v42_v61 = vsel %vm41_vm2, %v906_v54, %v876_v32  ;;  %v111_v4 = vsel %vm110_vm3, %v1036_v0, %v31_v59  ;;  %v498_v7 = vsel %vm110_vm3, %v1051_v5, %v426_v60 }
  0x89   :  { %v912_v57 = vunpack.i.h.bf16 %v910_v56  ;;  %v911_v58 = vunpack.i.l.bf16 %v910_v56  ;;  %v917_v9 = vunpack.i.h.bf16 %v1086_v55  ;;  %v916_v10 = vunpack.i.l.bf16 %v1086_v55 }
  0x8b   :  { %v53_v62 = vsel %vm52_vm1, %v911_v58, %v881_v22  ;;  %v446_v1 = vsel %vm52_vm1, %v912_v57, %v896_v40  ;;  %v65_v20 = vsel %vm63_vm5, %v916_v10, %v917_v9 }
  0x8c   :  { %v1094_v2 = vpop.permute.xlu1 %924  ;;  %v920_v3 = vpop.permute.xlu0 %919  ;;  %v113_v6 = vsel %vm110_vm3, %v42_v61, %v53_v62  ;;  %v500_v8 = vsel %vm110_vm3, %v436_v63, %v446_v1 }
  0x8d   :  { %v927_v11 = vunpack.i.h.bf16 %v1094_v2  ;;  %v926_v12 = vunpack.i.l.bf16 %v1094_v2  ;;  %v922_v13 = vunpack.i.h.bf16 %v920_v3  ;;  %v921_v14 = vunpack.i.l.bf16 %v920_v3 }
  0x8e   :  { %v822_v15 = vpack.c.bf16 %v113_v6, %v111_v4  ;;  %v830_v16 = vpack.c.bf16 %v500_v8, %v498_v7 }
  0x8f   :  { %v87_v17 = vsel %vm85_vm4, %v926_v12, %v927_v11  ;;  %v76_v21 = vsel %vm74_vm6, %v921_v14, %v922_v13 }
  0x90   :  { %823 = vmatpush1.bf16.msra.mxu0 %v822_v15  ;;  %831 = vmatpush1.bf16.msra.mxu1 %v830_v16  ;;  %v935_v0 = vpop.permute.xlu1 %934  ;;  %v930_v5 = vpop.permute.xlu0 %929  ;;  %v116_v29 = vsel %vm110_vm3, %v65_v20, %v76_v21  ;;  %v14_v16 = vld [vmem:[%s1455_s1] sm:$0xff] }
  0x91   :  { %v932_v18 = vunpack.i.h.bf16 %v930_v5  ;;  %v931_v19 = vunpack.i.l.bf16 %v930_v5  ;;  %v937_v26 = vunpack.i.h.bf16 %v935_v0  ;;  %v936_v30 = vunpack.i.l.bf16 %v935_v0 }
  0x93   :  { %v98_v22 = vsel %vm96_vm7, %v931_v19, %v932_v18  ;;  %v457_v39 = vsel %vm63_vm5, %v936_v30, %v937_v26 }
  0x94   :  { %v945_v23 = vpop.permute.xlu1 %944  ;;  %v940_v24 = vpop.permute.xlu0 %939  ;;  %v118_v25 = vsel %vm110_vm3, %v87_v17, %v98_v22 }
  0x95   :  { %v947_v27 = vunpack.i.h.bf16 %v945_v23  ;;  %v946_v28 = vunpack.i.l.bf16 %v945_v23  ;;  %v942_v31 = vunpack.i.h.bf16 %v940_v24  ;;  %v941_v32 = vunpack.i.l.bf16 %v940_v24 }
  0x96   :  { %v824_v33 = vpack.c.bf16 %v118_v25, %v116_v29 }
  0x97   :  { %v477_v36 = vsel %vm85_vm4, %v946_v28, %v947_v27  ;;  %v467_v40 = vsel %vm74_vm6, %v941_v32, %v942_v31 }
  0x98   :  { %825 = vmatprep.subr.bf16.mxu0 %v824_v33  ;;  %v955_v34 = vpop.permute.xlu1 %954  ;;  %v950_v35 = vpop.permute.xlu0 %949  ;;  %v503_v47 = vsel %vm110_vm3, %v457_v39, %v467_v40 }
  0x99   :  { %v952_v37 = vunpack.i.h.bf16 %v950_v35  ;;  %v951_v38 = vunpack.i.l.bf16 %v950_v35  ;;  %v957_v48 = vunpack.i.h.bf16 %v955_v34  ;;  %v956_v49 = vunpack.i.l.bf16 %v955_v34 }
  0x9b   :  { %v487_v41 = vsel %vm96_vm7, %v951_v38, %v952_v37  ;;  %v64_v59 = vsel %vm63_vm5, %v956_v49, %v916_v10  ;;  %v456_v60 = vsel %vm63_vm5, %v957_v48, %v936_v30 }
  0x9c   :  { %v965_v42 = vpop.permute.xlu1 %964  ;;  %v960_v43 = vpop.permute.xlu0 %959  ;;  %v505_v44 = vsel %vm110_vm3, %v477_v36, %v487_v41 }
  0x9d   :  { %v962_v45 = vunpack.i.h.bf16 %v960_v43  ;;  %v961_v46 = vunpack.i.l.bf16 %v960_v43  ;;  %v832_v50 = vpack.c.bf16 %v505_v44, %v503_v47  ;;  %v967_v51 = vunpack.i.h.bf16 %v965_v42 }
  0x9e   :  { %v966_v52 = vunpack.i.l.bf16 %v965_v42 }
  0x9f   :  { %833 = vmatprep.subr.bf16.mxu1 %v832_v50  ;;  %v75_v55 = vsel %vm74_vm6, %v961_v46, %v921_v14  ;;  %v466_v56 = vsel %vm74_vm6, %v962_v45, %v941_v32  ;;  %v476_v62 = vsel %vm85_vm4, %v967_v51, %v946_v28 }
  0xa0   :  { %v104_v53 = vpop.permute.xlu1 %103  ;;  %v970_v54 = vpop.permute.xlu0 %969  ;;  %v86_v61 = vsel %vm85_vm4, %v966_v52, %v926_v12  ;;  %v115_v4 = vsel %vm110_vm3, %v64_v59, %v75_v55  ;;  %v502_v7 = vsel %vm110_vm3, %v456_v60, %v466_v56  ;;  %v1007_v52 = vmov 683565275  }
  0xa1   :  { %v972_v57 = vunpack.i.h.bf16 %v970_v54  ;;  %v971_v58 = vunpack.i.l.bf16 %v970_v54  ;;  %v1008_v54 = vmov 2475754826   ;;  %v1009_v56 = vmov 2131351028  }
  0xa2   :  { %v1011_v60 = vmov 920167782  }
  0xa3   :  { %v97_v63 = vsel %vm96_vm7, %v971_v58, %v931_v19  ;;  %v486_v1 = vsel %vm96_vm7, %v972_v57, %v951_v38  ;;  %v1010_v58 = vmov 2102212464  }
  0xa4   :  { %v493_v2 = vpop.permute.xlu1 %492  ;;  %v106_v3 = vpop.permute.xlu0 %105  ;;  %v117_v6 = vsel %vm110_vm3, %v86_v61, %v97_v63  ;;  %v504_v8 = vsel %vm110_vm3, %v476_v62, %v486_v1 }
  0xa5   :  { %v826_v9 = vpack.c.bf16 %v117_v6, %v115_v4  ;;  %v834_v10 = vpack.c.bf16 %v504_v8, %v502_v7  ;;  %v109_v11 = vsel %vm107_vm8, %v104_v53, %v106_v3  ;;  %v1012_v7 = vmov 1326507024  }
  0xa7   :  { %827 = vmatpush1.bf16.msra.mxu0 %v826_v9  ;;  %835 = vmatpush1.bf16.msra.mxu1 %v834_v10 }
  0xa8   :  { %v102_v12 = vpop.permute.xlu1 %101  ;;  %v495_v13 = vpop.permute.xlu0 %494  ;;  %794 = vmatprep.subr.msk.mxu0 %vm110_vm3, %v109_v11 }
  0xa9   :  { %v108_v14 = vsel %vm107_vm8, %v102_v12, %v104_v53  ;;  %v497_v15 = vsel %vm107_vm8, %v493_v2, %v495_v13 }
  0xaa   :  { %807 = vmatprep.subr.msk.mxu1 %vm110_vm3, %v497_v15 }
  0xab   :  { %795 = vmatpush1.msk.msra.mxu0 %vm110_vm3, %v108_v14 }
  0xac   :  { %v491_v0 = vpop.permute.xlu0 %490  ;;  %796 = vmatmul.mubr.msk.f32.vlgmr.msra.gmra.mrb[0].mxu0 %vm124_vm9, %v14_v16 }
  0xad   :  { %v496_v5 = vsel %vm107_vm8, %v491_v0, %v493_v2 }
  0xae   :  { %808 = vmatpush1.msk.msra.mxu1 %vm110_vm3, %v496_v5 }
  0xaf   :  { %809 = vmatmul.mubr.msk.f32.vlgmr.msra.gmra.mrb[0].mxu1 %vm124_vm9, %v14_v16 }
  0xb9   :  { %v122_v17 = vpop.permute.xlu1 %121 }
 0x17f   :  { %v198_v18 = vpop.f32.mrb[0].mxu0 }
 0x180   :  { %v1141_v19 = vadd.f32 %v198_v18, %v122_v17  ;;  %v200_v20 = vpop.f32.mrb[1].mxu0 }
 0x181   :  { %v1143_v21 = vadd.f32 %v200_v20, %v122_v17 }
 0x182   :  { %v203_v22 = vand.u32 2147483647, %v1141_v19  ;;  %v206_v23 = vand.u32 2139095040, %v1141_v19  ;;  %v576_v24 = vpop.f32.mrb[0].mxu1  ;;  %vm205_vm7 = vcmp.lt.s32.totalorder %v1141_v19, 0 }
 0x183   :  { %v306_v25 = vand.u32 2147483647, %v1143_v21  ;;  %v309_v26 = vand.u32 2139095040, %v1143_v21  ;;  %v578_v27 = vpop.f32.mrb[1].mxu1  ;;  %v1149_v29 = vadd.f32 %v576_v24, %v122_v17 }
 0x184   :  { %v207_v28 = vshrl.u32 %v206_v23, 23  ;;  %v210_v30 = vand.u32 8388607, %v203_v22  ;;  %v1157_v46 = vadd.f32 %v578_v27, %v122_v17 }
 0x185   :  { %v310_v31 = vshrl.u32 %v309_v26, 23  ;;  %v313_v32 = vand.u32 8388607, %v306_v25  ;;  %v584_v35 = vand.u32 2139095040, %v1149_v29  ;;  %v581_v45 = vand.u32 2147483647, %v1149_v29 }
 0x186   :  { %v797_v33 = vadd.s32 4294967169, %v207_v28  ;;  %v211_v37 = vor.u32 8388608, %v210_v30 }
 0x187   :  { %v801_v34 = vadd.s32 4294967169, %v310_v31  ;;  %v314_v38 = vor.u32 8388608, %v313_v32  ;;  %v585_v40 = vshrl.u32 %v584_v35, 23 }
 0x188   :  { %v213_v36 = vadd.s32 1, %v797_v33  ;;  %v1159_v48 = vshll.u32 %v211_v37, 8 }
 0x189   :  { %v316_v39 = vadd.s32 1, %v801_v34  ;;  %v810_v42 = vadd.s32 4294967169, %v585_v40  ;;  %v1161_v50 = vshll.u32 %v314_v38, 8 }
 0x18a   :  { %vm214_vm10 = vcmp.gt.s32.totalorder %v213_v36, 0 }
 0x18b   :  { %v215_v41 = vsel %vm214_vm10, %v213_v36, 0  ;;  %vm317_vm11 = vcmp.gt.s32.totalorder %v316_v39, 0  ;;  %v1170_v63 = vadd.s32 1, %v810_v42 }
 0x18c   :  { %v217_v43 = vand.u32 31, %v215_v41  ;;  %v318_v44 = vsel %vm317_vm11, %v316_v39, 0  ;;  %v216_v47 = vshrl.u32 %v215_v41, 5 }
 0x18d   :  { %v320_v49 = vand.u32 31, %v318_v44  ;;  %v1168_v62 = vshrl.u32 %v318_v44, 5  ;;  %vm592_vm5 = vcmp.gt.s32.totalorder %v1170_v63, 0 }
 0x18e   :  { %v218_v51 = vsub.s32 32, %v217_v43  ;;  %v220_v53 = vshll.u32 %v1007_v52, %v217_v43  ;;  %v223_v55 = vshll.u32 %v1008_v54, %v217_v43  ;;  %v226_v57 = vshll.u32 %v1009_v56, %v217_v43 }
 0x18f   :  { %v229_v59 = vshll.u32 %v1010_v58, %v217_v43  ;;  %v232_v61 = vshll.u32 %v1011_v60, %v217_v43  ;;  %vm235_vm12 = vcmp.lt.s32.totalorder %v216_v47, 1  ;;  %vm237_vm13 = vcmp.lt.s32.totalorder %v216_v47, 3 }
 0x190   :  { %v219_v1 = vshrl.u32 %v1007_v52, %v218_v51  ;;  %v221_v2 = vshrl.u32 %v1008_v54, %v218_v51  ;;  %v224_v3 = vshrl.u32 %v1009_v56, %v218_v51  ;;  %v227_v4 = vshrl.u32 %v1010_v58, %v218_v51 }
 0x191   :  { %v230_v6 = vshrl.u32 %v1011_v60, %v218_v51  ;;  %v233_v8 = vshrl.u32 %v1012_v7, %v218_v51  ;;  %v321_v12 = vsub.s32 32, %v320_v49  ;;  %vm238_vm14 = vcmp.lt.s32.totalorder %v216_v47, 4 }
 0x192   :  { %v222_v9 = vor.u32 %v221_v2, %v220_v53  ;;  %v225_v10 = vor.u32 %v224_v3, %v223_v55  ;;  %v228_v11 = vor.u32 %v227_v4, %v226_v57  ;;  %v323_v15 = vshll.u32 %v1007_v52, %v320_v49 }
 0x193   :  { %v231_v13 = vor.u32 %v230_v6, %v229_v59  ;;  %v234_v14 = vor.u32 %v233_v8, %v232_v61  ;;  %v326_v24 = vshll.u32 %v1008_v54, %v320_v49  ;;  %vm236_vm15 = vcmp.lt.s32.totalorder %v216_v47, 2 }
 0x194   :  { %v239_v16 = vsel %vm235_vm12, %v219_v1, %v222_v9  ;;  %v240_v0 = vsel %vm238_vm14, %v228_v11, 2102212464  ;;  %v243_v5 = vsel %vm235_vm12, %v222_v9, %v225_v10  ;;  %v247_v17 = vsel %vm235_vm12, %v225_v10, %v228_v11 }
 0x195   :  { %v241_v18 = vsel %vm237_vm13, %v225_v10, %v240_v0  ;;  %v244_v20 = vsel %vm238_vm14, %v231_v13, 920167782  ;;  %v248_v23 = vsel %vm238_vm14, %v234_v14, 1326507024  ;;  %v324_v28 = vshrl.u32 %v1008_v54, %v321_v12 }
 0x196   :  { %v245_v26 = vsel %vm237_vm13, %v228_v11, %v244_v20  ;;  %v249_v27 = vsel %vm237_vm13, %v231_v13, %v248_v23  ;;  %v242_v30 = vsel %vm236_vm15, %v239_v16, %v241_v18  ;;  %v327_v33 = vshrl.u32 %v1009_v56, %v321_v12 }
 0x197   :  { %v246_v31 = vsel %vm236_vm15, %v243_v5, %v245_v26  ;;  %v250_v32 = vsel %vm236_vm15, %v247_v17, %v249_v27  ;;  %v325_v38 = vor.u32 %v324_v28, %v323_v15  ;;  %v329_v40 = vshll.u32 %v1009_v56, %v320_v49 }
 0x198   :  { %v1186_v34 = vmul.u32.u64.low %v1159_v48, %v250_v32  ;;  %v1187_v35 = vmul.u32.u64.high %v1159_v48, %v250_v32, %v1186_v34  ;;  %v1190_v36 = vmul.u32.u64.low %v1159_v48, %v246_v31  ;;  %v1191_v37 = vmul.u32.u64.high %v1159_v48, %v246_v31, %v1190_v36 }
 0x199   :  { %v328_v39 = vor.u32 %v327_v33, %v326_v24  ;;  %v330_v41 = vshrl.u32 %v1010_v58, %v321_v12  ;;  %v332_v42 = vshll.u32 %v1010_v58, %v320_v49  ;;  %v333_v43 = vshrl.u32 %v1011_v60, %v321_v12 }
 0x19a   :  { %v335_v44 = vshll.u32 %v1011_v60, %v320_v49  ;;  %v336_v47 = vshrl.u32 %v1012_v7, %v321_v12  ;;  %v258_v51 = vmul.u32 %v1159_v48, %v242_v30  ;;  %v322_v53 = vshrl.u32 %v1007_v52, %v321_v12 }
 0x19b   :  { %v331_v55 = vor.u32 %v330_v41, %v329_v40  ;;  %vm338_vm0 = vcmp.lt.s32.totalorder %v1168_v62, 1  ;;  %vm260_vm1 = vc.u32 %v1187_v35, %v1190_v36  ;;  %v261_v57 = vadd.s32 1, %v1191_v37 }
 0x19c   :  { %v334_v59 = vor.u32 %v333_v43, %v332_v42  ;;  %vm339_vm2 = vcmp.lt.s32.totalorder %v1168_v62, 2  ;;  %v337_v61 = vor.u32 %v336_v47, %v335_v44  ;;  %vm340_vm3 = vcmp.lt.s32.totalorder %v1168_v62, 3 }
 0x19d   :  { %vm341_vm4 = vcmp.lt.s32.totalorder %v1168_v62, 4  ;;  %v346_v49 = vsel %vm338_vm0, %v325_v38, %v328_v39  ;;  %v262_v48 = vsel %vm260_vm1, %v261_v57, %v1191_v37  ;;  %v350_v3 = vsel %vm338_vm0, %v328_v39, %v331_v55 }
 0x19e   :  { %v343_v1 = vsel %vm341_vm4, %v331_v55, 2102212464  ;;  %v347_v2 = vsel %vm341_vm4, %v334_v59, 920167782  ;;  %v263_v4 = vadd.s32 %v262_v48, %v258_v51  ;;  %v342_v6 = vsel %vm338_vm0, %v322_v53, %v325_v38 }
 0x19f   :  { %v348_v8 = vsel %vm340_vm3, %v331_v55, %v347_v2  ;;  %v351_v9 = vsel %vm341_vm4, %v337_v61, 1326507024  ;;  %v344_v10 = vsel %vm340_vm3, %v328_v39, %v343_v1  ;;  %v588_v17 = vand.u32 8388607, %v581_v45 }
 0x1a0   :  { %v349_v11 = vsel %vm339_vm2, %v346_v49, %v348_v8  ;;  %v352_v12 = vsel %vm340_vm3, %v334_v59, %v351_v9  ;;  %v264_v13 = vadd.s32 536870912, %v263_v4  ;;  %v593_v18 = vsel %vm592_vm5, %v1170_v63, 0 }
 0x1a1   :  { %v353_v14 = vsel %vm339_vm2, %v350_v3, %v352_v12  ;;  %v1216_v15 = vmul.u32.u64.low %v1161_v50, %v349_v11  ;;  %v1217_v16 = vmul.u32.u64.high %v1161_v50, %v349_v11, %v1216_v15  ;;  %v345_v23 = vsel %vm339_vm2, %v342_v6, %v344_v10 }
 0x1a2   :  { %v1221_v0 = vmul.u32.u64.low %v1161_v50, %v353_v14  ;;  %v1222_v5 = vmul.u32.u64.high %v1161_v50, %v353_v14, %v1221_v0  ;;  %v1227_v20 = vshrl.u32 %v264_v13, 30  ;;  %v595_v24 = vand.u32 31, %v593_v18 }
 0x1a3   :  { %v364_v27 = vadd.s32 1, %v1217_v16  ;;  %v361_v30 = vmul.u32 %v1161_v50, %v345_v23  ;;  %v589_v31 = vor.u32 8388608, %v588_v17  ;;  %v687_v32 = vand.u32 2139095040, %v1157_v46 }
 0x1a4   :  { %v266_v26 = vshll.u32 %v1227_v20, 30  ;;  %v596_v28 = vsub.s32 32, %v595_v24  ;;  %vm363_vm6 = vc.u32 %v1222_v5, %v1216_v15  ;;  %v684_v38 = vand.u32 2147483647, %v1157_v46 }
 0x1a5   :  { %v365_v33 = vsel %vm363_vm6, %v364_v27, %v1217_v16  ;;  %v1241_v41 = vshll.u32 %v589_v31, 8  ;;  %v688_v50 = vshrl.u32 %v687_v32, 23  ;;  %v1243_v43 = vshrl.u32 %v593_v18, 5 }
 0x1a6   :  { %v267_v63 = vsub.s32 %v263_v4, %v266_v26  ;;  %v366_v34 = vadd.s32 %v365_v33, %v361_v30  ;;  %v599_v37 = vshrl.u32 %v1008_v54, %v596_v28  ;;  %v602_v40 = vshrl.u32 %v1009_v56, %v596_v28 }
 0x1a7   :  { %v598_v44 = vshll.u32 %v1007_v52, %v595_v24  ;;  %v605_v47 = vshrl.u32 %v1010_v58, %v596_v28  ;;  %v601_v53 = vshll.u32 %v1008_v54, %v595_v24  ;;  %v607_v55 = vshll.u32 %v1010_v58, %v595_v24 }
 0x1a8   :  { %v269_v62 = vsub.s32 0, %v267_v63  ;;  %v367_v39 = vadd.s32 536870912, %v366_v34  ;;  %v608_v57 = vshrl.u32 %v1011_v60, %v596_v28  ;;  %v259_v59 = vadd.s32 %v1190_v36, %v1187_v35 }
 0x1a9   :  { %v600_v49 = vor.u32 %v599_v37, %v598_v44  ;;  %v604_v48 = vshll.u32 %v1009_v56, %v595_v24  ;;  %v603_v2 = vor.u32 %v602_v40, %v601_v53  ;;  %v611_v4 = vshrl.u32 %v1012_v7, %v596_v28 }
 0x1aa   :  { %v798_v42 = vmin.u32 %v269_v62, %v267_v63  ;;  %v1247_v51 = vshrl.u32 %v367_v39, 30  ;;  %v609_v3 = vor.u32 %v608_v57, %v607_v55  ;;  %v289_v8 = vsub.s32 4, %v1227_v20 }
 0x1ab   :  { %v606_v9 = vor.u32 %v605_v47, %v604_v48  ;;  %v814_v10 = vadd.s32 4294967169, %v688_v50  ;;  %v597_v35 = vshrl.u32 %v1007_v52, %v596_v28  ;;  %v610_v36 = vshll.u32 %v1011_v60, %v595_v24 }
 0x1ac   :  { %v271_v61 = vclz %v798_v42  ;;  %v369_v1 = vshll.u32 %v1247_v51, 30  ;;  %vm616_vm8 = vcmp.lt.s32.totalorder %v1243_v43, 4  ;;  %vm613_vm10 = vcmp.lt.s32.totalorder %v1243_v43, 1 }
 0x1ad   :  { %vm615_vm11 = vcmp.lt.s32.totalorder %v1243_v43, 3  ;;  %v622_v12 = vsel %vm616_vm8, %v609_v3, 920167782  ;;  %v612_v16 = vor.u32 %v611_v4, %v610_v36  ;;  %v621_v0 = vsel %vm613_vm10, %v600_v49, %v603_v2 }
 0x1ae   :  { %v799_v6 = vadd.s32 4294967294, %v271_v61  ;;  %v1259_v11 = vsub.s32 %v366_v34, %v369_v1  ;;  %vm1273_vm12 = vcmp.le.f32.partialorder %v203_v22, 0.7853982  ;;  %vm614_vm13 = vcmp.lt.s32.totalorder %v1243_v43, 2 }
 0x1af   :  { %v623_v24 = vsel %vm615_vm11, %v606_v9, %v622_v12  ;;  %v617_v28 = vsel %vm613_vm10, %v597_v35, %v600_v49  ;;  %v618_v30 = vsel %vm616_vm8, %v606_v9, 2102212464  ;;  %v625_v33 = vsel %vm613_vm10, %v603_v2, %v606_v9 }
 0x1b0   :  { %vm800_vm9 = vcmp.lt.s32.totalorder %v799_v6, 0  ;;  %v372_v14 = vsub.s32 0, %v1259_v11  ;;  %v624_v32 = vsel %vm614_vm13, %v621_v0, %v623_v24  ;;  %v619_v50 = vsel %vm615_vm11, %v603_v2, %v618_v30 }
 0x1b1   :  { %v274_v13 = vsel %vm800_vm9, 0, %v799_v6  ;;  %v1292_v62 = vmul.u32.u64.low %v1241_v41, %v624_v32  ;;  %v1293_v37 = vmul.u32.u64.high %v1241_v41, %v624_v32, %v1292_v62  ;;  %v1304_v53 = vand.u32 8388607, %v684_v38 }
 0x1b2   :  { %v275_v18 = vsub.s32 32, %v274_v13  ;;  %v279_v23 = vsub.s32 4294967266, %v274_v13  ;;  %v276_v26 = vshll.u32 %v267_v63, %v274_v13  ;;  %v802_v27 = vmin.u32 %v372_v14, %v1259_v11 }
 0x1b3   :  { %v626_v63 = vsel %vm616_vm8, %v612_v16, 1326507024  ;;  %v694_v55 = vadd.s32 1, %v814_v10  ;;  %v620_v48 = vsel %vm614_vm13, %v617_v28, %v619_v50  ;;  %v639_v1 = vadd.s32 1, %v1293_v37 }
 0x1b4   :  { %v277_v22 = vshrl.u32 %v259_v59, %v275_v18  ;;  %v280_v31 = vadd.s32 127, %v279_v23  ;;  %v374_v34 = vclz %v802_v27  ;;  %v627_v42 = vsel %vm615_vm11, %v609_v3, %v626_v63 }
 0x1b5   :  { %v628_v47 = vsel %vm614_vm13, %v625_v33, %v627_v42  ;;  %v290_v59 = vsel %vm205_vm7, %v289_v8, %v1227_v20  ;;  %vm695_vm15 = vcmp.gt.s32.totalorder %v694_v55, 0  ;;  %v362_v20 = vadd.s32 %v1216_v15, %v1222_v5 }
 0x1b6   :  { %v278_v39 = vor.u32 %v277_v22, %v276_v26  ;;  %v281_v40 = vshll.u32 %v280_v31, 23  ;;  %v803_v44 = vadd.s32 4294967294, %v374_v34  ;;  %v696_v6 = vsel %vm695_vm15, %v694_v55, 0 }
 0x1b7   :  { %v1310_v61 = vmul.u32.u64.low %v1241_v41, %v628_v47  ;;  %v1311_v49 = vmul.u32.u64.high %v1241_v41, %v628_v47, %v1310_v61  ;;  %v292_v9 = vsel %vm1273_vm12, 0, %v290_v59  ;;  %v636_v36 = vmul.u32 %v1241_v41, %v620_v48 }
 0x1b8   :  { %v282_v57 = vor.u32 4788187, %v281_v40  ;;  %vm804_vm14 = vcmp.lt.s32.totalorder %v803_v44, 0  ;;  %v285_v3 = vcvt.s32.f32 %v278_v39  ;;  %v698_v43 = vand.u32 31, %v696_v6 }
 0x1b9   :  { %v377_v4 = vsel %vm804_vm14, 0, %v803_v44  ;;  %vm638_vm0 = vc.u32 %v1311_v49, %v1292_v62  ;;  %vm308_vm1 = vcmp.lt.s32.totalorder %v1143_v21, 0  ;;  %v1326_v18 = vand.u32 3, %v292_v9 }
 0x1ba   :  { %v283_v2 = vand.u32 2147483647, %v282_v57  ;;  %v378_v8 = vsub.s32 32, %v377_v4  ;;  %v382_v10 = vsub.s32 4294967266, %v377_v4  ;;  %v379_v12 = vshll.u32 %v1259_v11, %v377_v4 }
 0x1bb   :  { %v640_v16 = vsel %vm638_vm0, %v639_v1, %v1293_v37  ;;  %v699_v5 = vsub.s32 32, %v698_v43  ;;  %v392_v41 = vsub.s32 4, %v1247_v51  ;;  %v692_v26 = vor.u32 8388608, %v1304_v53 }
 0x1bc   :  { %v286_v35 = vmul.f32 %v285_v3, %v283_v2  ;;  %v380_v13 = vshrl.u32 %v362_v20, %v378_v8  ;;  %v383_v14 = vadd.s32 127, %v382_v10  ;;  %v641_v15 = vadd.s32 %v640_v16, %v636_v36 }
 0x1bd   :  { %v1332_v11 = vshrl.u32 %v696_v6, 5  ;;  %v701_v30 = vshll.u32 %v1007_v52, %v698_v43  ;;  %v702_v32 = vshrl.u32 %v1008_v54, %v699_v5  ;;  %v705_v33 = vshrl.u32 %v1009_v56, %v699_v5 }
 0x1be   :  { %v287_v0 = vxor.u32 2147483648, %v286_v35  ;;  %v381_v23 = vor.u32 %v380_v13, %v379_v12  ;;  %v384_v24 = vshll.u32 %v383_v14, 23  ;;  %v642_v28 = vadd.s32 536870912, %v641_v15 }
 0x1bf   :  { %v707_v63 = vshll.u32 %v1009_v56, %v698_v43  ;;  %v708_v37 = vshrl.u32 %v1010_v58, %v699_v5  ;;  %v704_v50 = vshll.u32 %v1008_v54, %v698_v43  ;;  %v710_v44 = vshll.u32 %v1010_v58, %v698_v43 }
 0x1c0   :  { %v288_v27 = vsel %vm205_vm7, %v287_v0, %v286_v35  ;;  %v385_v31 = vor.u32 4788187, %v384_v24  ;;  %v1340_v34 = vshrl.u32 %v642_v28, 30  ;;  %v388_v40 = vcvt.s32.f32 %v381_v23 }
 0x1c1   :  { %v291_v22 = vsel %vm1273_vm12, %v1141_v19, %v288_v27  ;;  %v709_v42 = vor.u32 %v708_v37, %v707_v63  ;;  %v711_v47 = vshrl.u32 %v1011_v60, %v699_v5  ;;  %v703_v55 = vor.u32 %v702_v32, %v701_v30 }
 0x1c2   :  { %981 = vcosq.f32 %v291_v22  ;;  %v386_v39 = vand.u32 2147483647, %v385_v31  ;;  %v644_v17 = vshll.u32 %v1340_v34, 30  ;;  %v706_v57 = vor.u32 %v705_v33, %v704_v50 }
 0x1c3   :  { %983 = vsinq.f32 %v291_v22  ;;  %v714_v59 = vshrl.u32 %v1012_v7, %v699_v5  ;;  %vm1351_vm2 = vcmp.le.f32.partialorder %v306_v25, 0.7853982  ;;  %v393_v54 = vsel %vm308_vm1, %v392_v41, %v1247_v51 }
 0x1c4   :  { %v389_v53 = vmul.f32 %v388_v40, %v386_v39  ;;  %v1358_v61 = vsub.s32 %v641_v15, %v644_v17  ;;  %v712_v58 = vor.u32 %v711_v47, %v710_v44  ;;  %vm298_vm3 = vcmp.eq.s32.totalorder %v1326_v18, 0 }
 0x1c5   :  { %v713_v1 = vshll.u32 %v1011_v60, %v698_v43  ;;  %vm719_vm4 = vcmp.lt.s32.totalorder %v1332_v11, 4  ;;  %v1363_v7 = vshll.u32 %v692_v26, 8  ;;  %vm297_vm5 = vcmp.lt.s32.totalorder %v1326_v18, 2 }
 0x1c6   :  { %v390_v48 = vxor.u32 2147483648, %v389_v53  ;;  %v647_v25 = vsub.s32 0, %v1358_v61  ;;  %v700_v2 = vshrl.u32 %v1007_v52, %v699_v5  ;;  %vm716_vm6 = vcmp.lt.s32.totalorder %v1332_v11, 1 }
 0x1c7   :  { %v721_v51 = vsel %vm719_vm4, %v709_v42, 2102212464  ;;  %v715_v4 = vor.u32 %v714_v59, %v713_v1  ;;  %v724_v60 = vsel %vm716_vm6, %v703_v55, %v706_v57  ;;  %v725_v6 = vsel %vm719_vm4, %v712_v58, 920167782 }
 0x1c8   :  { %v391_v3 = vsel %vm308_vm1, %v390_v48, %v389_v53  ;;  %v811_v52 = vmin.u32 %v647_v25, %v1358_v61  ;;  %vm717_vm7 = vcmp.lt.s32.totalorder %v1332_v11, 2  ;;  %vm718_vm8 = vcmp.lt.s32.totalorder %v1332_v11, 3 }
 0x1c9   :  { %v394_v9 = vsel %vm1351_vm2, %v1143_v21, %v391_v3  ;;  %v720_v20 = vsel %vm716_vm6, %v700_v2, %v703_v55  ;;  %v722_v8 = vsel %vm718_vm8, %v706_v57, %v721_v51  ;;  %v726_v10 = vsel %vm718_vm8, %v709_v42, %v725_v6 }
 0x1ca   :  { %985 = vcosq.f32 %v394_v9  ;;  %v649_v36 = vclz %v811_v52  ;;  %v727_v43 = vsel %vm717_vm7, %v724_v60, %v726_v10  ;;  %v728_v12 = vsel %vm716_vm6, %v706_v57, %v709_v42 }
 0x1cb   :  { %987 = vsinq.f32 %v394_v9  ;;  %v729_v16 = vsel %vm719_vm4, %v715_v4, 1326507024  ;;  %v1396_v0 = vmul.u32.u64.low %v1363_v7, %v727_v43  ;;  %v1397_v15 = vmul.u32.u64.high %v1363_v7, %v727_v43, %v1396_v0 }
 0x1cc   :  { %v982_v35 = vpop.eup %981  ;;  %vm301_vm9 = vcmp.eq.s32.totalorder %v1326_v18, 2  ;;  %v812_v23 = vadd.s32 4294967294, %v649_v36  ;;  %v730_v24 = vsel %vm718_vm8, %v712_v58, %v729_v16  ;;  %v395_v26 = vsel %vm1351_vm2, 0, %v393_v54 }
 0x1cd   :  { %v984_v13 = vpop.eup %983  ;;  %v302_v14 = vxor.u32 2147483648, %v982_v35  ;;  %v723_v27 = vsel %vm717_vm7, %v720_v20, %v722_v8  ;;  %v731_v28 = vsel %vm717_vm7, %v728_v12, %v730_v24  ;;  %vm295_vm11 = vweird.f32 %v1141_v19 }
 0x1ce   :  { %v299_v5 = vxor.u32 2147483648, %v984_v13  ;;  %vm813_vm10 = vcmp.lt.s32.totalorder %v812_v23, 0  ;;  %v1412_v22 = vmul.u32.u64.low %v1363_v7, %v731_v28  ;;  %v1413_v31 = vmul.u32.u64.high %v1363_v7, %v731_v28, %v1412_v22 }
 0x1cf   :  { %v303_v41 = vsel %vm301_vm9, %v302_v14, %v984_v13  ;;  %v652_v33 = vsel %vm813_vm10, 0, %v812_v23  ;;  %v742_v63 = vadd.s32 1, %v1397_v15  ;;  %v637_v11 = vadd.s32 %v1292_v62, %v1311_v49 }
 0x1d0   :  { %v300_v30 = vsel %vm298_vm3, %v982_v35, %v299_v5  ;;  %v653_v39 = vsub.s32 32, %v652_v33  ;;  %v657_v40 = vsub.s32 4294967266, %v652_v33  ;;  %v399_v50 = vand.u32 3, %v395_v26 }
 0x1d1   :  { %v304_v32 = vsel %vm297_vm5, %v300_v30, %v303_v41  ;;  %v739_v17 = vmul.u32 %v1363_v7, %v723_v27  ;;  %v654_v19 = vshll.u32 %v1358_v61, %v652_v33  ;;  %vm741_vm12 = vc.u32 %v1413_v31, %v1396_v0 }
 0x1d2   :  { %v305_v37 = vsel %vm295_vm11, nan, %v304_v32  ;;  %v655_v18 = vshrl.u32 %v637_v11, %v653_v39  ;;  %v658_v42 = vadd.s32 127, %v657_v40  ;;  %v743_v47 = vsel %vm741_vm12, %v742_v63, %v1397_v15 }
 0x1d3   :  { %409 = vst [vmem:[%s1456_s3] sm:$0xff] %v305_v37  ;;  %v744_v57 = vadd.s32 %v743_v47, %v739_v17  ;;  %vm404_vm13 = vcmp.eq.s32.totalorder %v399_v50, 2  ;;  %vm401_vm14 = vcmp.eq.s32.totalorder %v399_v50, 0  ;;  %vm398_vm15 = vweird.f32 %v1143_v21 }
 0x1d4   :  { %v986_v44 = vpop.eup %985  ;;  %v656_v53 = vor.u32 %v655_v18, %v654_v19  ;;  %v659_v55 = vshll.u32 %v658_v42, 23  ;;  %vm400_vm0 = vcmp.lt.s32.totalorder %v399_v50, 2  ;;  %vm583_vm1 = vcmp.lt.s32.totalorder %v1149_v29, 0 }
 0x1d5   :  { %v988_v62 = vpop.eup %987  ;;  %v405_v49 = vxor.u32 2147483648, %v986_v44  ;;  %v745_v58 = vadd.s32 536870912, %v744_v57  ;;  %vm582_vm2 = vcmp.le.f32.partialorder %v581_v45, 0.7853982  ;;  %v667_v6 = vsub.s32 4, %v1340_v34 }
 0x1d6   :  { %v402_v59 = vxor.u32 2147483648, %v988_v62  ;;  %v660_v54 = vor.u32 4788187, %v659_v55  ;;  %v663_v7 = vcvt.s32.f32 %v656_v53  ;;  %v740_v45 = vadd.s32 %v1396_v0, %v1413_v31 }
 0x1d7   :  { %v406_v56 = vsel %vm404_vm13, %v405_v49, %v988_v62  ;;  %v746_v25 = vshrl.u32 %v745_v58, 30  ;;  %v668_v8 = vsel %vm583_vm1, %v667_v6, %v1340_v34  ;;  %vm673_vm7 = vweird.f32 %v1149_v29 }
 0x1d8   :  { %v403_v61 = vsel %vm401_vm14, %v986_v44, %v402_v59  ;;  %v661_v1 = vand.u32 2147483647, %v660_v54  ;;  %v670_v36 = vsel %vm582_vm2, 0, %v668_v8  ;;  %vm686_vm8 = vcmp.lt.s32.totalorder %v1157_v46, 0 }
 0x1d9   :  { %v407_v48 = vsel %vm400_vm0, %v403_v61, %v406_v56  ;;  %v747_v3 = vshll.u32 %v746_v25, 30  ;;  %v674_v12 = vand.u32 3, %v670_v36  ;;  %vm685_vm9 = vcmp.le.f32.partialorder %v684_v38, 0.7853982 }
 0x1da   :  { %v408_v2 = vsel %vm398_vm15, nan, %v407_v48  ;;  %v664_v51 = vmul.f32 %v663_v7, %v661_v1  ;;  %v770_v39 = vsub.s32 4, %v746_v25  ;;  %vm776_vm13 = vweird.f32 %v1157_v46 }
 0x1db   :  { %410 = vst [vmem:[%s1456_s3 + $0x8] sm:$0xff] %v408_v2  ;;  %v748_v60 = vsub.s32 %v744_v57, %v747_v3  ;;  %vm679_vm4 = vcmp.eq.s32.totalorder %v674_v12, 2  ;;  %vm676_vm5 = vcmp.eq.s32.totalorder %v674_v12, 0  ;;  %vm675_vm6 = vcmp.lt.s32.totalorder %v674_v12, 2 }
 0x1dc   :  { %v665_v4 = vxor.u32 2147483648, %v664_v51 }
 0x1dd   :  { %v750_v9 = vsub.s32 0, %v748_v60 }
 0x1de   :  { %v666_v21 = vsel %vm583_vm1, %v665_v4, %v664_v51 }
 0x1df   :  { %v669_v52 = vsel %vm582_vm2, %v1149_v29, %v666_v21  ;;  %v815_v20 = vmin.u32 %v750_v9, %v748_v60  ;;  %v771_v29 = vsel %vm686_vm8, %v770_v39, %v746_v25 }
 0x1e0   :  { %989 = vcosq.f32 %v669_v52  ;;  %v773_v50 = vsel %vm685_vm9, 0, %v771_v29 }
 0x1e1   :  { %991 = vsinq.f32 %v669_v52  ;;  %v752_v10 = vclz %v815_v20  ;;  %v777_v17 = vand.u32 3, %v773_v50 }
 0x1e3   :  { %v816_v35 = vadd.s32 4294967294, %v752_v10  ;;  %vm782_vm10 = vcmp.eq.s32.totalorder %v777_v17, 2  ;;  %vm779_vm11 = vcmp.eq.s32.totalorder %v777_v17, 0  ;;  %vm778_vm12 = vcmp.lt.s32.totalorder %v777_v17, 2 }
 0x1e5   :  { %vm817_vm3 = vcmp.lt.s32.totalorder %v816_v35, 0 }
 0x1e6   :  { %v755_v43 = vsel %vm817_vm3, 0, %v816_v35 }
 0x1e7   :  { %v756_v13 = vsub.s32 32, %v755_v43  ;;  %v760_v14 = vsub.s32 4294967266, %v755_v43  ;;  %v757_v15 = vshll.u32 %v748_v60, %v755_v43 }
 0x1e9   :  { %v758_v5 = vshrl.u32 %v740_v45, %v756_v13  ;;  %v761_v23 = vadd.s32 127, %v760_v14 }
 0x1ea   :  { %v990_v16 = vpop.eup %989 }
 0x1eb   :  { %v992_v24 = vpop.eup %991  ;;  %v680_v41 = vxor.u32 2147483648, %v990_v16  ;;  %v759_v34 = vor.u32 %v758_v5, %v757_v15  ;;  %v762_v27 = vshll.u32 %v761_v23, 23 }
 0x1ec   :  { %v677_v26 = vxor.u32 2147483648, %v992_v24 }
 0x1ed   :  { %v681_v28 = vsel %vm679_vm4, %v680_v41, %v992_v24  ;;  %v763_v22 = vor.u32 4788187, %v762_v27  ;;  %v766_v33 = vcvt.s32.f32 %v759_v34 }
 0x1ee   :  { %v678_v30 = vsel %vm676_vm5, %v990_v16, %v677_v26 }
 0x1ef   :  { %v682_v0 = vsel %vm675_vm6, %v678_v30, %v681_v28  ;;  %v764_v32 = vand.u32 2147483647, %v763_v22 }
 0x1f0   :  { %v683_v31 = vsel %vm673_vm7, nan, %v682_v0 }
 0x1f1   :  { %818 = vst [vmem:[%s1456_s3 + $0x10] sm:$0xff] %v683_v31  ;;  %v767_v63 = vmul.f32 %v766_v33, %v764_v32 }
 0x1f3   :  { %v768_v37 = vxor.u32 2147483648, %v767_v63 }
 0x1f5   :  { %v769_v11 = vsel %vm686_vm8, %v768_v37, %v767_v63 }
 0x1f6   :  { %v772_v40 = vsel %vm685_vm9, %v1157_v46, %v769_v11 }
 0x1f7   :  { %993 = vcosq.f32 %v772_v40 }
 0x1f8   :  { %995 = vsinq.f32 %v772_v40 }
 0x201   :  { %v994_v19 = vpop.eup %993 }
 0x202   :  { %v996_v18 = vpop.eup %995  ;;  %v783_v42 = vxor.u32 2147483648, %v994_v19 }
 0x203   :  { %v780_v44 = vxor.u32 2147483648, %v996_v18 }
 0x204   :  { %v784_v47 = vsel %vm782_vm10, %v783_v42, %v996_v18 }
 0x205   :  { %v781_v62 = vsel %vm779_vm11, %v994_v19, %v780_v44 }
 0x206   :  { %v785_v38 = vsel %vm778_vm12, %v781_v62, %v784_v47 }
 0x207   :  { %v786_v49 = vsel %vm776_vm13, nan, %v785_v38 }
 0x208   :  { %819 = vst [vmem:[%s1456_s3 + $0x18] sm:$0xff] %v786_v49 }

</bundles_post_ra>
